<compile_context>
chip_gen: v7x
topology: tpu7x:2x2x1
jax: 0.10.0
libtpu: 0.0.40
codegen_flags: <defaults>
</compile_context>

<pallas_src>
import jax
import jax.numpy as jnp
from jax.experimental import pallas as pl
from jax.experimental.pallas import tpu as pltpu


def _cv_kernel(dt_ref, x_ref, o_ref):
    # dt_ref: (1,) float32 in SMEM
    # x_ref : (TB, 1, 1, F) VMEM block  -- only the last timestep of this batch tile
    # o_ref : (TB, 4) VMEM block
    dt = dt_ref[0]
    last = x_ref[:, 0, 0, :].astype(jnp.float32)      # (TB, F)
    pos = last[:, 2:4]                                # x_center, y_center
    vel = last[:, 5:7]                                # x_vel,    y_vel
    # columns: [x_center + dt*x_vel, y_center + dt*y_vel, x_vel, y_vel]
    o_ref[...] = jnp.concatenate([pos + dt * vel, vel], axis=1).astype(o_ref.dtype)


def constant_velocity_forward(x, dt=1.0, block_b=1024):
    """x: (B, T, F) with F >= 7. Returns (B, 4) in x.dtype."""
    B, T, F = x.shape
    assert F >= 7, "need at least 7 features (indices 2,3,5,6 used)"

    TB = min(B, block_b)                 # batch tile (leading dim: no 8/128 rule)
    grid_b = pl.cdiv(B, TB)

    # Free reshape: (B, T, F) -> (B, T, 1, F).  The block's last two dims (1, F)
    # equal the full array dims; the last-timestep selection happens via the
    # index_map on the (leading) T axis, so only B*F elements are DMA'd.
    x4 = x.reshape(B, T, 1, F)

    dt_arr = jnp.asarray(dt, dtype=jnp.float32).reshape((1,))

    out = pl.pallas_call(
        _cv_kernel,
        out_shape=jax.ShapeDtypeStruct((B, 4), x.dtype),
        grid=(grid_b,),
        in_specs=[
            # dt lives in SMEM (runtime scalar, no retrace per value).
            pl.BlockSpec(memory_space=pltpu.MemorySpace.SMEM),
            # Last-timestep-only block: (TB, 1, 1, F), time index fixed at T-1.
            pl.BlockSpec((TB, 1, 1, F), lambda i: (i, T - 1, 0, 0)),
        ],
        # Partial last block (B % TB != 0) is masked automatically by Pallas,
        # so no wrapper-side padding / full-array copy is needed.
        out_specs=pl.BlockSpec((TB, 4), lambda i: (i, 0)),
        compiler_params=pltpu.CompilerParams(
            dimension_semantics=("parallel",)),
    )(dt_arr, x4)

    return out


def _reference(x, dt=1.0):
    x_center = x[:, -1, 2]
    y_center = x[:, -1, 3]
    x_vel = x[:, -1, 5]
    y_vel = x[:, -1, 6]
    return jnp.stack(
        [x_center + dt * x_vel, y_center + dt * y_vel, x_vel, y_vel], axis=1
    )


if __name__ == "__main__":
    key = jax.random.PRNGKey(0)
    B, T, F = 2, 8, 8          # (batch, seq, features), F >= 7
    x = jax.random.normal(key, (B, T, F), dtype=jnp.float32)

    dt = 0.5                   # non-trivial dt to exercise the SMEM scalar path
    out = jax.block_until_ready(constant_velocity_forward(x, dt=dt))

    ref = _reference(x, dt=dt)
    assert out.shape == (B, 4)
    assert jnp.allclose(out, ref, atol=1e-5, rtol=1e-5)
    print("KERNEL_OK")
</pallas_src>

<mosaic_0001>
module attributes {stable_mosaic.version = 11 : i64} {
  func.func @_cv_kernel(%arg0: i32, %arg1: memref<1xf32, #tpu.memory_space<smem>>, %arg2: memref<2x1x1x8xf32, #tpu.memory_space<vmem>>, %arg3: memref<2x4xf32, #tpu.memory_space<vmem>>) attributes {dimension_semantics = [#tpu.dimension_semantics<parallel>], iteration_bounds = array<i64: 1>, scalar_prefetch = 0 : i64, scratch_operands = 0 : i64, tpu.core_type = #tpu.core_type<tc>, window_params = [{transform_indices = @transform_0, window_bounds = array<i64: 1>}, {transform_indices = @transform_1, window_bounds = array<i64: 2, 1, 1, 8>}, {transform_indices = @transform_2, window_bounds = array<i64: 2, 4>}]} {
    %c0 = arith.constant 0 : index
    %0 = memref.load %arg1[%c0] : memref<1xf32, #tpu.memory_space<smem>>
    %c0_0 = arith.constant 0 : index
    %c0_1 = arith.constant 0 : index
    %c0_2 = arith.constant 0 : index
    %c0_3 = arith.constant 0 : index
    %1 = vector.load %arg2[%c0_0, %c0_1, %c0_2, %c0_3] : memref<2x1x1x8xf32, #tpu.memory_space<vmem>>, vector<2x1x1x8xf32>
    %2 = vector.shape_cast %1 : vector<2x1x1x8xf32> to vector<2x8xf32>
    %3 = vector.extract_strided_slice %2 {offsets = [0, 2], sizes = [2, 2], strides = [1, 1]} : vector<2x8xf32> to vector<2x2xf32>
    %4 = vector.extract_strided_slice %2 {offsets = [0, 5], sizes = [2, 2], strides = [1, 1]} : vector<2x8xf32> to vector<2x2xf32>
    %5 = vector.broadcast %0 : f32 to vector<2x2xf32>
    %6 = arith.mulf %5, %4 : vector<2x2xf32>
    %7 = arith.addf %3, %6 : vector<2x2xf32>
    %8 = tpu.concatenate %7, %4 in 1 : vector<2x2xf32>, vector<2x2xf32> -> vector<2x4xf32>
    %c0_4 = arith.constant 0 : index
    %c0_5 = arith.constant 0 : index
    %9 = vector.load %arg3[%c0_4, %c0_5] : memref<2x4xf32, #tpu.memory_space<vmem>>, vector<2x4xf32>
    tpu.vector_store %arg3[%c0_4, %c0_5], %8 {strides = array<i32>} : memref<2x4xf32, #tpu.memory_space<vmem>>, vector<2x4xf32>,
    return
  }
  func.func @transform_0(%arg0: i32) -> i32 {
    %c0_i32 = arith.constant 0 : i32
    %c0_i32_0 = arith.constant 0 : i32
    return %c0_i32 : i32
  }
  func.func @transform_1(%arg0: i32) -> (i32, i32, i32, i32) {
    %c7_i32 = arith.constant 7 : i32
    %c0_i32 = arith.constant 0 : i32
    %c0_i32_0 = arith.constant 0 : i32
    %c0_i32_1 = arith.constant 0 : i32
    return %arg0, %c7_i32, %c0_i32, %c0_i32_0 : i32, i32, i32, i32
  }
  func.func @transform_2(%arg0: i32) -> (i32, i32) {
    %c0_i32 = arith.constant 0 : i32
    %c0_i32_0 = arith.constant 0 : i32
    return %arg0, %c0_i32 : i32, i32
  }
}

</mosaic_0001>

<bundles_post_ra>
// kernel: tpu_custom_call.1
= control target key start
LH: loop header
LB: loop body
LE: loop exit
PB: predicated region body
PF: predicated region fallthrough
CT: control target
= control target key end

     0   :  { %8 = vsyncpa [#allocation4], 0  ;;  %s212_s0 = inlined_call_operand.<no memory space> [shape: f32[1], index: 0, kind: input, shape index: {}]   ;;  %s213_s1 = inlined_call_operand.hbm [shape: f32[2,8,1,8], index: 1, kind: input, shape index: {}]   ;;  %s214_s2 = inlined_call_operand.hbm [shape: f32[2,4], index: 2, kind: output, shape index: {}]  }
   0x1   :  { %9 = vsyncpa [#allocation5], 0  ;;  %s17_s11 = scalar_lea.hbm %s213_s1, 112  ;;  %s162_s12 = smov [#allocation3]  }
   0x2   :  { %s18_s13 = sshll.u32 %s162_s12, 4  ;;  %s135_s16 = scalar_lea.hbm %s213_s1, 144  ;;  %s19_s13 = int_to_ptr.vmem [resolvable:$true] %s18_s13 }
   0x3   :  { %p112_p0 = scmp.ne.s32.totalorder %s17_s11, %s135_s16  ;;  %s113_s19 = scalar_lea.hbm %s213_s1, 256 }
   0x4   :  { %p114_p1 = scmp.lt.u32.totalorder %s17_s11, %s213_s1  ;;  %p115_p2 = scmp.lt.u32.totalorder %s113_s19, %s135_s16 }
   0x5   :  { %p117_p4 = scmp.lt.u32.totalorder %s135_s16, %s17_s11 }
   0x6   :  { %p116_p3 = por %p115_p2, %p114_p1 }
   0x8   :  { %p118_p5 = por %p117_p4, %p116_p3 }
   0xa   :  { %p119_p6 = pnand %p118_p5, %p112_p0 }
   0xc   :  { %122 = shalt.err (!%p119_p6)
}
   0xd   :  { %s123_s22 = scalar_lea.vmem %s19_s13, 32  ;;  %p128_p8 = scmp.lt.s32.totalorder %s19_s13, %s19_s13 }
   0xe   :  { %p124_p7 = scmp.ne.s32.totalorder %s19_s13, %s123_s22  ;;  %p129_p9 = scmp.lt.s32.totalorder %s123_s22, %s123_s22 }
  0x10   :  { %p130_p10 = por %p129_p9, %p128_p8 }
  0x12   :  { %p131_p11 = pnand %p130_p10, %p124_p7 }
  0x14   :  { %134 = shalt.err (!%p131_p11)
}
  0x15   :  { %s163_s23 = smov 128   ;;  %s164_s24 = smov 16  }
  0x16   :  { %s165_s25 = smov 1  }
  0x17   :  { %24 = dma.hbm_to_vmem [thread:$0]  %s17_s11, 32, %s19_s13, [#allocation4], %s163_s23, %s164_s24, %s165_s25  }
  0x18   :  { %158 = dma.done.wait [#allocation4], 32  }
  0x19   :  { %159 = vsyncadd [#allocation4], 4294967264  ;;  %v31_v0 = vstv %s212_s0  ;;  %v29_v1 = vld [vmem:[#allocation3] sm:$0x1]  ;;  %v30_v2 = vld [vmem:[#allocation3 + $0x1] sm:$0x1]  ;;  %v50_v7 = vlaneseq }
  0x1a   :  { %v32_v3 = vmul.f32 %v31_v0, %v29_v1  ;;  %v33_v4 = vmul.f32 %v31_v0, %v30_v2  ;;  %s166_s27 = smov 125   ;;  %v167_v5 = vmov 1966171168   ;;  %v66_v12 = vcombine.low %v29_v1, %v30_v2  ;;  %s168_s0 = smov 126  }
  0x1b   :  { %v48_v6 = vunpack.c.l.s4 %v167_v5  ;;  %v51_v10 = vshrl.u32 %v50_v7, 7  ;;  %s169_s28 = smov [#allocation6]   ;;  %vm84_vm0 = vcmask 15360   ;;  %vm86_vm1 = vcmask 25600  }
  0x1c   :  { %36 = vrot.lane.b32.xlu0 %v32_v3, %s166_s27  ;;  %s94_s29 = sshll.u32 %s169_s28, 4  ;;  %s95_s29 = int_to_ptr.vmem [resolvable:$true] %s94_s29 }
  0x1d   :  { %v49_v9 = vunpack.c.0.s8 %v48_v6  ;;  %s136_s30 = scalar_lea.vmem %s95_s29, 32  ;;  %p141_p13 = scmp.lt.s32.totalorder %s95_s29, %s95_s29 }
  0x1e   :  { %p137_p12 = scmp.ne.s32.totalorder %s95_s29, %s136_s30  ;;  %p142_p0 = scmp.lt.s32.totalorder %s136_s30, %s136_s30 }
  0x1f   :  { %v52_v15 = vsub.s32 %v49_v9, %v51_v10 }
  0x20   :  { %38 = vrot.lane.b32.xlu0 %v33_v4, %s166_s27  ;;  %p143_p1 = por %p142_p0, %p141_p13 }
  0x21   :  { %v73_v18 = vrot.slane %v66_v12, %v52_v15 }
  0x22   :  { %p144_p2 = pnand %p143_p1, %p137_p12 }
  0x23   :  { %v80_v20 = vrot.slane %v73_v18, %v52_v15 }
  0x8e   :  { %v37_v8 = vpop.permute.xlu0 %36 }
  0x8f   :  { %v42_v13 = vadd.f32 %v37_v8, %v29_v1 }
  0x92   :  { %v39_v11 = vpop.permute.xlu0 %38 }
  0x93   :  { %v43_v14 = vadd.f32 %v39_v11, %v30_v2 }
  0x95   :  { %v46_v16 = vcombine.low %v42_v13, %v43_v14 }
  0x97   :  { %v53_v17 = vrot.slane %v46_v16, %v52_v15 }
  0x99   :  { %v60_v19 = vrot.slane %v53_v17, %v52_v15 }
  0x9b   :  { %61 = vrot.lane.b32.xlu1 %v60_v19, %s168_s0 }
  0x9f   :  { %81 = vrot.lane.b32.xlu1 %v80_v20, %s166_s27 }
 0x10d   :  { %v62_v21 = vpop.permute.xlu1 %61 }
 0x111   :  { %v82_v22 = vpop.permute.xlu1 %81 }
 0x112   :  { %v85_v23 = vsel %vm84_vm0, %v62_v21, %v82_v22 }
 0x113   :  { %87 = vst.msk [vmem:[#allocation6] sm:$0x3] %vm86_vm1, %v85_v23 }
 0x114   :  { %147 = shalt.err (!%p144_p2)
}
 0x115   :  { %s148_s5 = scalar_lea.hbm %s214_s2, 32 }
 0x116   :  { %p149_p3 = scmp.ne.s32.totalorder %s214_s2, %s148_s5  ;;  %p152_p4 = scmp.lt.u32.totalorder %s148_s5, %s214_s2 }
 0x118   :  { %p154_p5 = pnand %p152_p4, %p149_p3 }
 0x11a   :  { %157 = shalt.err (!%p154_p5)
}
 0x11b   :  { %97 = dma.vmem_to_hbm [thread:$0]  %s95_s29, 32, %s214_s2, [#allocation5]  }
 0x11c   :  { %160 = dma.done.wait [#allocation5], 32  }
 0x11d   :  { %161 = vsyncadd [#allocation5], 4294967264 }
 0x11e   :  { %101 = vsyncpa [#allocation4], 1 }
 0x11f   :  { %102 = vsyncpa [#allocation5], 1 }

</bundles_post_ra>
